<compile_context>
chip_gen: v7x
topology: tpu7x:2x2x1
jax: 0.10.0
libtpu: 0.0.40
codegen_flags: <defaults>
</compile_context>

<pallas_src>
import functools

import jax
import jax.numpy as jnp
from jax import lax
from jax.experimental import pallas as pl
from jax.experimental.pallas import tpu as pltpu

BN_EPS = 1e-5
LANE = 128


def _round_up(n, m):
    return (n + m - 1) // m * m


# ---------------------------------------------------------------------------
# Capability probes (cached).
# ---------------------------------------------------------------------------
_SB_OK = None  # does this build accept pipeline_mode=pl.Buffered(1)?


def _probe_copy_kernel(x_ref, o_ref):
    o_ref[...] = x_ref[...]


def _single_buffer_supported():
    global _SB_OK
    if _SB_OK is None:
        try:
            spec = pl.BlockSpec((8, LANE), lambda i: (0, 0),
                                pipeline_mode=pl.Buffered(1))
            r = pl.pallas_call(
                _probe_copy_kernel,
                out_shape=jax.ShapeDtypeStruct((8, LANE), jnp.float32),
                grid=(1,),
                in_specs=[spec],
                out_specs=pl.BlockSpec((8, LANE), lambda i: (0, 0)),
            )(jnp.zeros((8, LANE), jnp.float32))
            jax.block_until_ready(r)
            _SB_OK = True
        except Exception:
            _SB_OK = False
    return _SB_OK


def _resident_spec(block_shape, index_map):
    """BlockSpec for a block-invariant operand: single-buffered if supported."""
    if _single_buffer_supported():
        return pl.BlockSpec(block_shape, index_map,
                            pipeline_mode=pl.Buffered(1))
    return pl.BlockSpec(block_shape, index_map)


def _vmem_capacity_bytes():
    try:
        cap = getattr(pltpu.get_tpu_info(), "vmem_capacity_bytes", None)
        if cap:
            return int(cap)
    except Exception:
        pass
    return 64 << 20  # conservative (v7x-sized) fallback


# ---------------------------------------------------------------------------
# Kernels.
# ---------------------------------------------------------------------------
def _stats_kernel(x_ref, w1t_ref, *out_refs, spill_h):
    """Pass 1: h = x @ W1^T (f32 acc on MXU) + per-tile BN sufficient stats.

    Optionally spills h to HBM (compute dtype) so pass 2 skips the matmul1
    recompute -- worth it when in_dim is large (recompute flops >> spill bytes).
    """
    h = jnp.dot(x_ref[...], w1t_ref[...], preferred_element_type=jnp.float32)
    if spill_h:
        h_ref, sum_ref, sumsq_ref = out_refs
        h_ref[...] = h.astype(h_ref.dtype)
    else:
        sum_ref, sumsq_ref = out_refs
    s = jnp.sum(h, axis=0, keepdims=True)
    sq = jnp.sum(h * h, axis=0, keepdims=True)
    sum_ref[...] = s.reshape(sum_ref.shape)
    sumsq_ref[...] = sq.reshape(sumsq_ref.shape)


def _proj_kernel(*refs, reload_h, has_bias):
    """Pass 2: BN as one broadcast FMA (scale/shift precomputed), ReLU, matmul2."""
    if reload_h:
        h_ref, scale_ref, shift_ref, w2t_ref, *rest = refs
        h = h_ref[...].astype(jnp.float32)
    else:
        x_ref, w1t_ref, scale_ref, shift_ref, w2t_ref, *rest = refs
        h = jnp.dot(x_ref[...], w1t_ref[...],
                    preferred_element_type=jnp.float32)
    if has_bias:
        b2_ref, o_ref = rest
    else:
        (o_ref,) = rest

    hr = jnp.maximum(h * scale_ref[...] + shift_ref[...], 0.0)
    out = jnp.dot(hr.astype(w2t_ref.dtype), w2t_ref[...],
                  preferred_element_type=jnp.float32)
    if has_bias:
        out = out + b2_ref[...]
    o_ref[...] = out.astype(o_ref.dtype)


# ---------------------------------------------------------------------------
# Wrapper.
# ---------------------------------------------------------------------------
def prepare_params(w1, gamma, beta, w2, b2=None, *, compute_dtype=jnp.bfloat16):
    """One-time weight preprocessing (cast, transpose, lane-pad).

    Cache the result and pass it via `params=` to avoid per-call HBM copies.
    w1: [hidden, in_dim]  (linear1.weight, bias=False)
    w2: [out_dim, hidden] (layer2.weight; out_dim == in_dim for MLP_BYOL)
    """
    hidden, in_dim = w1.shape
    out_dim = w2.shape[0]
    in_p = _round_up(in_dim, LANE)
    hid_p = _round_up(hidden, LANE)
    out_p = _round_up(out_dim, LANE)

    def pad2(a, r, c):
        if a.shape == (r, c):
            return a
        return jnp.zeros((r, c), a.dtype).at[:a.shape[0], :a.shape[1]].set(a)

    w1t = pad2(w1.astype(compute_dtype).T, in_p, hid_p)
    w2t = pad2(w2.astype(compute_dtype).T, hid_p, out_p)
    gamma_p = pad2(gamma.astype(jnp.float32).reshape(1, -1), 1, hid_p)
    beta_p = pad2(beta.astype(jnp.float32).reshape(1, -1), 1, hid_p)
    b2_p = None
    if b2 is not None:
        b2_p = pad2(b2.astype(jnp.float32).reshape(1, -1), 1, out_p)
    return dict(w1t=w1t, w2t=w2t, gamma=gamma_p, beta=beta_p, b2=b2_p,
                in_dim=in_dim, hidden=hidden, out_dim=out_dim,
                compute_dtype=compute_dtype)


def _estimate_vmem(tb, in_p, hid_p, out_p, isz, spill_h, wbuf):
    stats_pass = (wbuf * in_p * hid_p * isz            # W1^T resident
                  + 2 * tb * in_p * isz                # x tiles (dbl-buffered)
                  + (2 * tb * hid_p * isz if spill_h else 0)   # spilled h tiles
                  + 4 * 8 * hid_p * 4                  # stats output blocks
                  + tb * hid_p * 4)                    # live f32 h
    proj_pass = (wbuf * hid_p * out_p * isz                        # W2^T
                 + (0 if spill_h else wbuf * in_p * hid_p * isz)   # W1^T again
                 + 2 * tb * (hid_p if spill_h else in_p) * isz     # streamed in
                 + 2 * tb * out_p * 4                              # out tiles
                 + 2 * 8 * hid_p * 4 + 8 * out_p * 4               # scale/shift/b2
                 + tb * hid_p * 4 + tb * out_p * 4)                # live f32
    return max(stats_pass, proj_pass) + (2 << 20)


def mlp_byol_forward(x, w1=None, gamma=None, beta=None, w2=None, b2=None, *,
                     params=None, compute_dtype=jnp.bfloat16,
                     tile_b=None, spill_h=None):
    """Training-mode forward of MLP_BYOL:
         out = relu(BN1(x @ W1^T)) @ W2^T (+ b2 iff is_pred)
    BN uses the current batch mean / biased variance, eps=1e-5, affine.
    """
    if params is None:
        params = prepare_params(w1, gamma, beta, w2, b2,
                                compute_dtype=compute_dtype)
    cdt = params["compute_dtype"]
    in_dim, hidden, out_dim = (params["in_dim"], params["hidden"],
                               params["out_dim"])
    w1t, w2t = params["w1t"], params["w2t"]
    gamma_p, beta_p, b2_p = params["gamma"], params["beta"], params["b2"]
    has_bias = b2_p is not None
    in_p, hid_p = w1t.shape
    out_p = w2t.shape[1]

    B = x.shape[0]
    out_dtype = x.dtype
    isz = jnp.dtype(cdt).itemsize
    sublane = max(8, 32 // isz)            # packed-sublane rows: f32->8, bf16->16

    # Spill h only when recomputing matmul1 would cost more than the HBM
    # round-trip of h (large in_dim).
    if spill_h is None:
        spill_h = in_p > 256

    # Per-generation VMEM budget and tile size.
    budget = int(0.85 * _vmem_capacity_bytes())
    wbuf = 1 if _single_buffer_supported() else 2
    cand = tile_b if tile_b is not None else (512 if budget > (80 << 20) else 256)
    cand = max(sublane, _round_up(cand, sublane))
    while (cand > sublane and
           _estimate_vmem(cand, in_p, hid_p, out_p, isz, spill_h, wbuf) > budget):
        cand = max(sublane, _round_up(cand // 2, sublane))
    # Minimise batch padding: even tiles, rounded to packed-sublane granularity.
    nb = max(1, -(-B // cand))
    tb = _round_up(-(-B // nb), sublane)
    b_p = nb * tb

    est = _estimate_vmem(tb, in_p, hid_p, out_p, isz, spill_h, wbuf)
    vmem_limit = int(min(max(2 * est, 32 << 20), budget))

    # Pad x only when needed (batch and/or feature).
    x_c = x.astype(cdt)
    if x_c.shape != (b_p, in_p):
        x_p = jnp.zeros((b_p, in_p), cdt).at[:B, :in_dim].set(x_c)
    else:
        x_p = x_c

    # ---------------- pass 1: matmul1 + BN sufficient statistics ------------
    stats_out_shapes = []
    stats_out_specs = []
    if spill_h:
        stats_out_shapes.append(jax.ShapeDtypeStruct((b_p, hid_p), cdt))
        stats_out_specs.append(pl.BlockSpec((tb, hid_p), lambda b: (b, 0)))
    stats_out_shapes += [jax.ShapeDtypeStruct((nb, 1, hid_p), jnp.float32)] * 2
    stats_out_specs += [pl.BlockSpec((1, 1, hid_p), lambda b: (b, 0, 0))] * 2

    stats_cost = pl.CostEstimate(
        flops=int(2 * b_p * in_p * hid_p + 3 * b_p * hid_p),
        transcendentals=0,
        bytes_accessed=int(b_p * in_p * isz + in_p * hid_p * isz
                           + (b_p * hid_p * isz if spill_h else 0)
                           + 2 * nb * hid_p * 4),
    )

    stats_res = pl.pallas_call(
        functools.partial(_stats_kernel, spill_h=spill_h),
        out_shape=tuple(stats_out_shapes),
        grid_spec=pltpu.PrefetchScalarGridSpec(
            num_scalar_prefetch=0,
            grid=(nb,),
            in_specs=[pl.BlockSpec((tb, in_p), lambda b: (b, 0)),
                      _resident_spec((in_p, hid_p), lambda b: (0, 0))],
            out_specs=stats_out_specs,
        ),
        compiler_params=pltpu.CompilerParams(
            dimension_semantics=("parallel",),   # batch tiles independent
            vmem_limit_bytes=vmem_limit,
        ),
        cost_estimate=stats_cost,
    )(x_p, w1t)

    if spill_h:
        h_p, psum, psumsq = stats_res
    else:
        psum, psumsq = stats_res

    # ---------------- fold BN into one (scale, shift) row (tiny JAX) --------
    inv_n = jnp.float32(1.0 / B)
    mean = jnp.sum(psum[:, 0, :], axis=0) * inv_n
    # TODO(synk): one-pass E[h^2]-mean^2 can cancel when |mean| >> std; use a
    # Welford-style per-tile combine if that regime matters.
    var = jnp.maximum(jnp.sum(psumsq[:, 0, :], axis=0) * inv_n - mean * mean, 0.0)
    inv_std = lax.rsqrt(var + BN_EPS)
    scale_row = gamma_p[0] * inv_std
    shift_row = beta_p[0] - mean * scale_row
    scale2 = scale_row.reshape(1, hid_p)
    shift2 = shift_row.reshape(1, hid_p)

    # ---------------- pass 2: BN FMA + ReLU + matmul2 ------------------------
    proj_inputs = []
    proj_specs = []
    if spill_h:
        proj_inputs += [h_p]
        proj_specs += [pl.BlockSpec((tb, hid_p), lambda b: (b, 0))]
    else:
        proj_inputs += [x_p, w1t]
        proj_specs += [pl.BlockSpec((tb, in_p), lambda b: (b, 0)),
                       _resident_spec((in_p, hid_p), lambda b: (0, 0))]
    proj_inputs += [scale2, shift2, w2t]
    proj_specs += [_resident_spec((1, hid_p), lambda b: (0, 0)),
                   _resident_spec((1, hid_p), lambda b: (0, 0)),
                   _resident_spec((hid_p, out_p), lambda b: (0, 0))]
    if has_bias:
        proj_inputs += [b2_p]
        proj_specs += [_resident_spec((1, out_p), lambda b: (0, 0))]

    proj_cost = pl.CostEstimate(
        flops=int(2 * b_p * hid_p * out_p
                  + (0 if spill_h else 2 * b_p * in_p * hid_p)
                  + 4 * b_p * hid_p),
        transcendentals=0,
        bytes_accessed=int((b_p * hid_p * isz if spill_h
                            else b_p * in_p * isz + in_p * hid_p * isz)
                           + hid_p * out_p * isz
                           + b_p * out_p * jnp.dtype(out_dtype).itemsize),
    )

    out_full = pl.pallas_call(
        functools.partial(_proj_kernel, reload_h=spill_h, has_bias=has_bias),
        out_shape=jax.ShapeDtypeStruct((b_p, out_p), out_dtype),
        grid_spec=pltpu.PrefetchScalarGridSpec(
            num_scalar_prefetch=0,
            grid=(nb,),
            in_specs=proj_specs,
            out_specs=pl.BlockSpec((tb, out_p), lambda b: (b, 0)),
        ),
        compiler_params=pltpu.CompilerParams(
            dimension_semantics=("parallel",),   # batch tiles independent
            vmem_limit_bytes=vmem_limit,
        ),
        cost_estimate=proj_cost,
    )(*proj_inputs)

    return out_full[:B, :out_dim]


def reference_forward(x, w1, gamma, beta, w2, b2=None):
    x = x.astype(jnp.float32)
    h = x @ w1.astype(jnp.float32).T
    mean = jnp.mean(h, axis=0, keepdims=True)
    var = jnp.mean((h - mean) ** 2, axis=0, keepdims=True)
    hn = (h - mean) * lax.rsqrt(var + BN_EPS) * gamma + beta
    hr = jnp.maximum(hn, 0.0)
    out = hr @ w2.astype(jnp.float32).T
    if b2 is not None:
        out = out + b2
    return out


if __name__ == "__main__":
    # Small shapes consistent with the module: x [B, in_dim], hidden_dim.
    B, in_dim, hidden_dim = 8, 32, 64

    key = jax.random.PRNGKey(0)
    kx, kw1, kw2, kg, kb, kb2 = jax.random.split(key, 6)

    x = jax.random.normal(kx, (B, in_dim), jnp.float32)
    # nn.Linear / nn.BatchNorm1d-shaped parameters.
    w1 = jax.random.normal(kw1, (hidden_dim, in_dim), jnp.float32) * 0.05
    w2 = jax.random.normal(kw2, (in_dim, hidden_dim), jnp.float32) * 0.05
    gamma = 1.0 + 0.1 * jax.random.normal(kg, (hidden_dim,), jnp.float32)
    beta = 0.1 * jax.random.normal(kb, (hidden_dim,), jnp.float32)
    b2 = 0.1 * jax.random.normal(kb2, (in_dim,), jnp.float32)

    ref = reference_forward(x, w1, gamma, beta, w2)

    # f32 opt-out, recompute-h path (small in_dim default) — exact structure test.
    out = jax.block_until_ready(
        mlp_byol_forward(x, w1, gamma, beta, w2, compute_dtype=jnp.float32))
    assert out.shape == (B, in_dim)
    assert jnp.allclose(out, ref, atol=1e-4, rtol=1e-4), (
        float(jnp.max(jnp.abs(out - ref))))

    # f32, spill-h path (what large in_dim would pick) with cached params.
    params = prepare_params(w1, gamma, beta, w2, compute_dtype=jnp.float32)
    out_sp = jax.block_until_ready(
        mlp_byol_forward(x, params=params, spill_h=True))
    assert jnp.allclose(out_sp, ref, atol=1e-4, rtol=1e-4)

    # is_pred=True path: layer2 with bias.
    out_pred = jax.block_until_ready(
        mlp_byol_forward(x, w1, gamma, beta, w2, b2=b2,
                         compute_dtype=jnp.float32))
    ref_pred = reference_forward(x, w1, gamma, beta, w2, b2)
    assert jnp.allclose(out_pred, ref_pred, atol=1e-4, rtol=1e-4)

    # Default path: bf16 MXU operands, BN/reductions stay f32 in-kernel.
    out_bf = jax.block_until_ready(mlp_byol_forward(x, w1, gamma, beta, w2))
    ref_bf = reference_forward(
        x.astype(jnp.bfloat16).astype(jnp.float32),
        w1.astype(jnp.bfloat16).astype(jnp.float32), gamma, beta,
        w2.astype(jnp.bfloat16).astype(jnp.float32))
    assert out_bf.shape == (B, in_dim)
    assert jnp.allclose(out_bf, ref_bf, atol=5e-2, rtol=5e-2)

    print("KERNEL_OK")
</pallas_src>

<mosaic_0001>
module attributes {stable_mosaic.version = 11 : i64} {
  func.func @_probe_copy_kernel(%arg0: i32, %arg1: memref<8x128xf32, #tpu.memory_space<vmem>>, %arg2: memref<8x128xf32, #tpu.memory_space<vmem>>) attributes {dimension_semantics = [#tpu.dimension_semantics<arbitrary>], iteration_bounds = array<i64: 1>, scalar_prefetch = 0 : i64, scratch_operands = 0 : i64, tpu.core_type = #tpu.core_type<tc>, window_params = [{pipeline_mode = #tpu.pipeline_mode<synchronous>, transform_indices = @transform_0, window_bounds = array<i64: 8, 128>}, {pipeline_mode = #tpu.pipeline_mode<synchronous>, transform_indices = @transform_1, window_bounds = array<i64: 8, 128>}]} {
    %c0 = arith.constant 0 : index
    %c0_0 = arith.constant 0 : index
    %0 = vector.load %arg1[%c0, %c0_0] : memref<8x128xf32, #tpu.memory_space<vmem>>, vector<8x128xf32>
    %c0_1 = arith.constant 0 : index
    %c0_2 = arith.constant 0 : index
    %1 = vector.load %arg2[%c0_1, %c0_2] : memref<8x128xf32, #tpu.memory_space<vmem>>, vector<8x128xf32>
    tpu.vector_store %arg2[%c0_1, %c0_2], %0 {strides = array<i32>} : memref<8x128xf32, #tpu.memory_space<vmem>>, vector<8x128xf32>,
    return
  }
  func.func @transform_0(%arg0: i32) -> (i32, i32) {
    %c0_i32 = arith.constant 0 : i32
    %c0_i32_0 = arith.constant 0 : i32
    %c0_i32_1 = arith.constant 0 : i32
    return %c0_i32, %c0_i32_0 : i32, i32
  }
  func.func @transform_1(%arg0: i32) -> (i32, i32) {
    %c0_i32 = arith.constant 0 : i32
    %c0_i32_0 = arith.constant 0 : i32
    %c0_i32_1 = arith.constant 0 : i32
    return %c0_i32, %c0_i32_0 : i32, i32
  }
}

module attributes {stable_mosaic.version = 11 : i64} {
  func.func @_stats_kernel(%arg0: i32, %arg1: memref<8x128xf32, #tpu.memory_space<vmem>>, %arg2: memref<128x128xf32, #tpu.memory_space<vmem>>, %arg3: memref<1x1x128xf32, #tpu.memory_space<vmem>>, %arg4: memref<1x1x128xf32, #tpu.memory_space<vmem>>) attributes {dimension_semantics = [#tpu.dimension_semantics<parallel>], iteration_bounds = array<i64: 1>, scalar_prefetch = 0 : i64, scratch_operands = 0 : i64, tpu.core_type = #tpu.core_type<tc>, window_params = [{transform_indices = @transform_0, window_bounds = array<i64: 8, 128>}, {pipeline_mode = #tpu.pipeline_mode<synchronous>, transform_indices = @transform_1, window_bounds = array<i64: 128, 128>}, {transform_indices = @transform_2, window_bounds = array<i64: 1, 1, 128>}, {transform_indices = @transform_3, window_bounds = array<i64: 1, 1, 128>}]} {
    %c0 = arith.constant 0 : index
    %c0_0 = arith.constant 0 : index
    %0 = vector.load %arg1[%c0, %c0_0] : memref<8x128xf32, #tpu.memory_space<vmem>>, vector<8x128xf32>
    %c0_1 = arith.constant 0 : index
    %c0_2 = arith.constant 0 : index
    %1 = vector.load %arg2[%c0_1, %c0_2] : memref<128x128xf32, #tpu.memory_space<vmem>>, vector<128x128xf32>
    %cst = arith.constant dense<0.000000e+00> : vector<8x128xf32>
    %2 = tpu.matmul %0, %1, %cst {dimension_numbers = #tpu.dot_dimension_numbers<[1], [0], [0], [1], [0, 0, 1, 1], [], []>} : vector<8x128xf32>, vector<128x128xf32>, vector<8x128xf32> -> vector<8x128xf32>
    %cst_3 = arith.constant dense<0.000000e+00> : vector<128xf32>
    %3 = vector.multi_reduction <add>, %2, %cst_3 [0] : vector<8x128xf32> to vector<128xf32>
    %4 = vector.shape_cast %3 : vector<128xf32> to vector<1x128xf32>
    %5 = arith.mulf %2, %2 : vector<8x128xf32>
    %cst_4 = arith.constant dense<0.000000e+00> : vector<128xf32>
    %6 = vector.multi_reduction <add>, %5, %cst_4 [0] : vector<8x128xf32> to vector<128xf32>
    %7 = vector.shape_cast %6 : vector<128xf32> to vector<1x128xf32>
    %8 = vector.shape_cast %4 : vector<1x128xf32> to vector<1x1x128xf32>
    %c0_5 = arith.constant 0 : index
    %c0_6 = arith.constant 0 : index
    %c0_7 = arith.constant 0 : index
    %9 = vector.load %arg3[%c0_5, %c0_6, %c0_7] : memref<1x1x128xf32, #tpu.memory_space<vmem>>, vector<1x1x128xf32>
    tpu.vector_store %arg3[%c0_5, %c0_6, %c0_7], %8 {strides = array<i32>} : memref<1x1x128xf32, #tpu.memory_space<vmem>>, vector<1x1x128xf32>,
    %10 = vector.shape_cast %7 : vector<1x128xf32> to vector<1x1x128xf32>
    %c0_8 = arith.constant 0 : index
    %c0_9 = arith.constant 0 : index
    %c0_10 = arith.constant 0 : index
    %11 = vector.load %arg4[%c0_8, %c0_9, %c0_10] : memref<1x1x128xf32, #tpu.memory_space<vmem>>, vector<1x1x128xf32>
    tpu.vector_store %arg4[%c0_8, %c0_9, %c0_10], %10 {strides = array<i32>} : memref<1x1x128xf32, #tpu.memory_space<vmem>>, vector<1x1x128xf32>,
    return
  }
  func.func @transform_0(%arg0: i32) -> (i32, i32) {
    %c0_i32 = arith.constant 0 : i32
    %c0_i32_0 = arith.constant 0 : i32
    return %arg0, %c0_i32 : i32, i32
  }
  func.func @transform_1(%arg0: i32) -> (i32, i32) {
    %c0_i32 = arith.constant 0 : i32
    %c0_i32_0 = arith.constant 0 : i32
    %c0_i32_1 = arith.constant 0 : i32
    return %c0_i32, %c0_i32_0 : i32, i32
  }
  func.func @transform_2(%arg0: i32) -> (i32, i32, i32) {
    %c0_i32 = arith.constant 0 : i32
    %c0_i32_0 = arith.constant 0 : i32
    %c0_i32_1 = arith.constant 0 : i32
    return %arg0, %c0_i32, %c0_i32_0 : i32, i32, i32
  }
  func.func @transform_3(%arg0: i32) -> (i32, i32, i32) {
    %c0_i32 = arith.constant 0 : i32
    %c0_i32_0 = arith.constant 0 : i32
    %c0_i32_1 = arith.constant 0 : i32
    return %arg0, %c0_i32, %c0_i32_0 : i32, i32, i32
  }
}

</mosaic_0001>

<bundles_post_ra>
// kernel: tpu_custom_call.1
= control target key start
LH: loop header
LB: loop body
LE: loop exit
PB: predicated region body
PF: predicated region fallthrough
CT: control target
= control target key end

     0   :  { %6 = vsyncpa [#allocation3], 0  ;;  %s124_s0 = inlined_call_operand.hbm [shape: f32[8,128], index: 0, kind: input, shape index: {}]   ;;  %s125_s1 = inlined_call_operand.hbm [shape: f32[8,128], index: 1, kind: output, shape index: {}]  }
   0x1   :  { %7 = vsyncpa [#allocation4], 0  ;;  %s88_s6 = smov [#allocation2]   ;;  %s40_s10 = scalar_lea.hbm %s124_s0, 128 }
   0x2   :  { %s14_s7 = sshll.u32 %s88_s6, 4  ;;  %p41_p0 = scmp.ne.s32.totalorder %s124_s0, %s40_s10  ;;  %s15_s7 = int_to_ptr.vmem [resolvable:$true] %s14_s7 }
   0x3   :  { %p44_p1 = scmp.lt.u32.totalorder %s40_s10, %s124_s0 }
   0x5   :  { %p46_p2 = pnand %p44_p1, %p41_p0 }
   0x7   :  { %49 = shalt.err (!%p46_p2)
}
   0x8   :  { %s50_s15 = scalar_lea.vmem %s15_s7, 128  ;;  %p55_p4 = scmp.lt.s32.totalorder %s15_s7, %s15_s7 }
   0x9   :  { %p51_p3 = scmp.ne.s32.totalorder %s15_s7, %s50_s15  ;;  %p56_p5 = scmp.lt.s32.totalorder %s50_s15, %s50_s15 }
   0xb   :  { %p57_p6 = por %p56_p5, %p55_p4 }
   0xd   :  { %p58_p7 = pnand %p57_p6, %p51_p3 }
   0xf   :  { %61 = shalt.err (!%p58_p7)
}
  0x10   :  { %17 = dma.hbm_to_vmem [thread:$0]  %s124_s0, 128, %s15_s7, [#allocation3]  }
  0x11   :  { %84 = dma.done.wait [#allocation3], 128  }
  0x12   :  { %85 = vsyncadd [#allocation3], 4294967168  ;;  %s89_s18 = smov [#allocation5]   ;;  %v21_v0 = vld [vmem:[#allocation2] sm:$0xff] }
  0x13   :  { %s29_s19 = sshll.u32 %s89_s18, 4  ;;  %22 = vst [vmem:[#allocation5] sm:$0xff] %v21_v0  ;;  %s30_s19 = int_to_ptr.vmem [resolvable:$true] %s29_s19 }
  0x14   :  { %s62_s20 = scalar_lea.vmem %s30_s19, 128  ;;  %p67_p9 = scmp.lt.s32.totalorder %s30_s19, %s30_s19 }
  0x15   :  { %p63_p8 = scmp.ne.s32.totalorder %s30_s19, %s62_s20  ;;  %p68_p10 = scmp.lt.s32.totalorder %s62_s20, %s62_s20 }
  0x17   :  { %p69_p11 = por %p68_p10, %p67_p9 }
  0x19   :  { %p70_p12 = pnand %p69_p11, %p63_p8 }
  0x1b   :  { %73 = shalt.err (!%p70_p12)
}
  0x1c   :  { %s74_s23 = scalar_lea.hbm %s125_s1, 128 }
  0x1d   :  { %p75_p13 = scmp.ne.s32.totalorder %s125_s1, %s74_s23  ;;  %p78_p0 = scmp.lt.u32.totalorder %s74_s23, %s125_s1 }
  0x1f   :  { %p80_p1 = pnand %p78_p0, %p75_p13 }
  0x21   :  { %83 = shalt.err (!%p80_p1)
}
  0x22   :  { %32 = dma.vmem_to_hbm [thread:$0]  %s30_s19, 128, %s125_s1, [#allocation4]  }
  0x23   :  { %86 = dma.done.wait [#allocation4], 128  }
  0x24   :  { %87 = vsyncadd [#allocation4], 4294967168 }
  0x25   :  { %36 = vsyncpa [#allocation3], 1 }
  0x26   :  { %37 = vsyncpa [#allocation4], 1 }

// kernel: tpu_custom_call.1
= control target key start
LH: loop header
LB: loop body
LE: loop exit
PB: predicated region body
PF: predicated region fallthrough
CT: control target
= control target key end

     0   :  { %9 = vsyncpa [#allocation3], 0  ;;  %s446_s0 = inlined_call_operand.hbm [shape: f32[8,128], index: 0, kind: input, shape index: {}]   ;;  %s447_s1 = inlined_call_operand.hbm [shape: f32[128,128], index: 1, kind: input, shape index: {}]   ;;  %s448_s2 = inlined_call_operand.hbm [shape: f32[1,1,128], index: 2, kind: output, shape index: {0}]   ;;  %s449_s3 = inlined_call_operand.hbm [shape: f32[1,1,128], index: 3, kind: output, shape index: {1}]  }
   0x1   :  { %10 = vsyncpa [#allocation6], 0 }
   0x2   :  { %11 = vsyncpa [#allocation4], 0 }
   0x3   :  { %12 = vsyncpa [#allocation9], 0  ;;  %s354_s12 = smov [#allocation2]   ;;  %s355_s14 = smov [#allocation5]  }
   0x4   :  { %s19_s13 = sshll.u32 %s354_s12, 4  ;;  %s28_s15 = sshll.u32 %s355_s14, 4  ;;  %s20_s13 = int_to_ptr.vmem [resolvable:$true] %s19_s13  ;;  %s383_s15 = int_to_ptr.vmem [resolvable:$true] %s28_s15 }
   0x5   :  { %s258_s18 = scalar_lea.hbm %s446_s0, 128 }
   0x6   :  { %p259_p0 = scmp.ne.s32.totalorder %s446_s0, %s258_s18  ;;  %p262_p1 = scmp.lt.u32.totalorder %s258_s18, %s446_s0 }
   0x8   :  { %p264_p2 = pnand %p262_p1, %p259_p0 }
   0xa   :  { %267 = shalt.err (!%p264_p2)
}
   0xb   :  { %s268_s23 = scalar_lea.vmem %s20_s13, 128  ;;  %p273_p4 = scmp.lt.s32.totalorder %s20_s13, %s20_s13 }
   0xc   :  { %p269_p3 = scmp.ne.s32.totalorder %s20_s13, %s268_s23  ;;  %p274_p5 = scmp.lt.s32.totalorder %s268_s23, %s268_s23 }
   0xe   :  { %p275_p6 = por %p274_p5, %p273_p4 }
  0x10   :  { %p276_p7 = pnand %p275_p6, %p269_p3 }
  0x12   :  { %279 = shalt.err (!%p276_p7)
}
  0x13   :  { %22 = dma.hbm_to_vmem [thread:$0]  %s446_s0, 128, %s20_s13, [#allocation3]  }
  0x14   :  { %s280_s28 = scalar_lea.hbm %s447_s1, 2048 }
  0x15   :  { %p281_p8 = scmp.ne.s32.totalorder %s447_s1, %s280_s28  ;;  %p284_p9 = scmp.lt.u32.totalorder %s280_s28, %s447_s1 }
  0x17   :  { %p286_p10 = pnand %p284_p9, %p281_p8 }
  0x19   :  { %289 = shalt.err (!%p286_p10)
}
  0x1a   :  { %s290_s6 = scalar_lea.vmem %s383_s15, 2048  ;;  %p295_p12 = scmp.lt.s32.totalorder %s383_s15, %s383_s15 }
  0x1b   :  { %p291_p11 = scmp.ne.s32.totalorder %s383_s15, %s290_s6  ;;  %p296_p13 = scmp.lt.s32.totalorder %s290_s6, %s290_s6 }
  0x1d   :  { %p297_p0 = por %p296_p13, %p295_p12 }
  0x1f   :  { %p298_p1 = pnand %p297_p0, %p291_p11 }
  0x21   :  { %301 = shalt.err (!%p298_p1)
}
  0x22   :  { %s356_s0 = smov 128   ;;  %s357_s7 = smov 8  }
  0x23   :  { %34 = dma.hbm_to_vmem [thread:$0]  %s447_s1, 2048, %s383_s15, [#allocation6], %s356_s0, %s356_s0, %s357_s7  }
  0x24   :  { %346 = dma.done.wait [#allocation3], 128  }
  0x25   :  { %347 = vsyncadd [#allocation3], 4294967168 }
  0x26   :  { %348 = dma.done.wait [#allocation6], 2048  }
  0x27   :  { %349 = vsyncadd [#allocation6], 4294965248  ;;  %v358_v0 = vmov 0.0|0.0   ;;  %vm359_vm0 = vmmov 0   ;;  %v360_v1 = vmov 0.0   ;;  %v42_v2 = vld [vmem:[#allocation5] sm:$0xff] }
  0x28   :  { %225 = vmatprep.subr.bf16.mxu0 %v358_v0  ;;  %222 = vmatprep.mubr.msk.f32.mxu0 %vm359_vm0, %v360_v1  ;;  %v43_v3 = vld [vmem:[#allocation5 + $0x8] sm:$0xff]  ;;  %v44_v4 = vld [vmem:[#allocation5 + $0x10] sm:$0xff]  ;;  %v45_v6 = vld [vmem:[#allocation5 + $0x18] sm:$0xff]  ;;  %s361_s1 = smov [#allocation7]   ;;  %s362_s11 = smov [#allocation8]  }
  0x29   :  { %v226_v5 = vpack.c.bf16 %v43_v3, %v42_v2  ;;  %v229_v7 = vpack.c.bf16 %v45_v6, %v44_v4  ;;  %v46_v8 = vld [vmem:[#allocation5 + $0x20] sm:$0xff]  ;;  %v47_v9 = vld [vmem:[#allocation5 + $0x28] sm:$0xff]  ;;  %v48_v11 = vld [vmem:[#allocation5 + $0x30] sm:$0xff]  ;;  %s149_s10 = sshll.u32 %s361_s1, 4  ;;  %s159_s12 = sshll.u32 %s362_s11, 4  ;;  %s150_s10 = int_to_ptr.vmem [resolvable:$true] %s149_s10  ;;  %s414_s12 = int_to_ptr.vmem [resolvable:$true] %s159_s12 }
  0x2a   :  { %v232_v10 = vpack.c.bf16 %v47_v9, %v46_v8  ;;  %v49_v12 = vld [vmem:[#allocation5 + $0x38] sm:$0xff]  ;;  %v50_v14 = vld [vmem:[#allocation5 + $0x40] sm:$0xff]  ;;  %v51_v15 = vld [vmem:[#allocation5 + $0x48] sm:$0xff]  ;;  %s302_s13 = scalar_lea.vmem %s150_s10, 16  ;;  %s306_s14 = scalar_lea.vmem %s150_s10, 32 }
  0x2b   :  { %227 = vmatpush3.bf16.msra.mxu0 %v226_v5  ;;  %v235_v13 = vpack.c.bf16 %v49_v12, %v48_v11  ;;  %v238_v16 = vpack.c.bf16 %v51_v15, %v50_v14  ;;  %v52_v17 = vld [vmem:[#allocation5 + $0x50] sm:$0xff]  ;;  %v53_v18 = vld [vmem:[#allocation5 + $0x58] sm:$0xff]  ;;  %v54_v20 = vld [vmem:[#allocation5 + $0x60] sm:$0xff]  ;;  %p303_p2 = scmp.ne.s32.totalorder %s150_s10, %s302_s13  ;;  %p307_p3 = scmp.lt.s32.totalorder %s150_s10, %s150_s10 }
  0x2c   :  { %228 = vmatprep.subr.bf16.mxu0 %v358_v0  ;;  %v241_v19 = vpack.c.bf16 %v53_v18, %v52_v17  ;;  %v55_v21 = vld [vmem:[#allocation5 + $0x68] sm:$0xff]  ;;  %v56_v23 = vld [vmem:[#allocation5 + $0x70] sm:$0xff]  ;;  %v57_v24 = vld [vmem:[#allocation5 + $0x78] sm:$0xff]  ;;  %p308_p4 = scmp.lt.s32.totalorder %s306_s14, %s302_s13 }
  0x2d   :  { %v244_v22 = vpack.c.bf16 %v55_v21, %v54_v20  ;;  %v247_v25 = vpack.c.bf16 %v57_v24, %v56_v23  ;;  %v41_v26 = vld [vmem:[#allocation2] sm:$0xff] }
  0x2e   :  { %p309_p5 = por %p308_p4, %p307_p3 }
  0x2f   :  { %230 = vmatpush3.bf16.msra.mxu0 %v229_v7 }
  0x30   :  { %231 = vmatprep.subr.bf16.mxu0 %v358_v0  ;;  %p310_p6 = pnand %p309_p5, %p303_p2 }
  0x33   :  { %233 = vmatpush3.bf16.msra.mxu0 %v232_v10 }
  0x34   :  { %234 = vmatprep.subr.bf16.mxu0 %v358_v0 }
  0x37   :  { %236 = vmatpush3.bf16.msra.mxu0 %v235_v13 }
  0x38   :  { %237 = vmatprep.subr.bf16.mxu0 %v358_v0 }
  0x3b   :  { %239 = vmatpush3.bf16.msra.mxu0 %v238_v16 }
  0x3c   :  { %240 = vmatprep.subr.bf16.mxu0 %v358_v0 }
  0x3f   :  { %242 = vmatpush3.bf16.msra.mxu0 %v241_v19 }
  0x40   :  { %243 = vmatprep.subr.bf16.mxu0 %v358_v0 }
  0x43   :  { %245 = vmatpush3.bf16.msra.mxu0 %v244_v22 }
  0x44   :  { %246 = vmatprep.subr.bf16.mxu0 %v358_v0 }
  0x47   :  { %248 = vmatpush3.bf16.msra.mxu0 %v247_v25 }
  0x4a   :  { %223 = vmatmul.mubr.f32.vlgmr.msra.gmra.mrb[0].mxu0 %v41_v26 }
 0x11d   :  { %v124_v27 = vpop.f32.mrb[0].mxu0 }
 0x11e   :  { %v128_v28 = vrot.slane %v124_v27, 4  ;;  %v134_v29 = vmul.f32 %v124_v27, %v124_v27  ;;  %v224_v30 = vpop.f32.mrb[1].mxu0 }
 0x120   :  { %v129_v31 = vadd.f32 %v128_v28, %v124_v27  ;;  %v135_v32 = vrot.slane %v134_v29, 4 }
 0x122   :  { %v130_v33 = vrot.slane %v129_v31, 2  ;;  %v136_v34 = vadd.f32 %v135_v32, %v134_v29 }
 0x124   :  { %v131_v35 = vadd.f32 %v130_v33, %v129_v31  ;;  %v137_v36 = vrot.slane %v136_v34, 2 }
 0x126   :  { %v132_v37 = vrot.slane %v131_v35, 1  ;;  %v138_v38 = vadd.f32 %v137_v36, %v136_v34 }
 0x128   :  { %v133_v39 = vadd.f32 %v132_v37, %v131_v35  ;;  %v139_v40 = vrot.slane %v138_v38, 1 }
 0x12a   :  { %141 = vst [vmem:[#allocation7] sm:$0x1] %v133_v39  ;;  %v140_v41 = vadd.f32 %v139_v40, %v138_v38 }
 0x12b   :  { %313 = shalt.err (!%p310_p6)
}
 0x12c   :  { %s314_s17 = scalar_lea.hbm %s448_s2, 16 }
 0x12d   :  { %p315_p7 = scmp.ne.s32.totalorder %s448_s2, %s314_s17  ;;  %p318_p8 = scmp.lt.u32.totalorder %s314_s17, %s448_s2 }
 0x12f   :  { %p320_p9 = pnand %p318_p8, %p315_p7 }
 0x131   :  { %323 = shalt.err (!%p320_p9)
}
 0x132   :  { %152 = dma.vmem_to_hbm [thread:$0]  %s150_s10, 16, %s448_s2, [#allocation4]   ;;  %142 = vst [vmem:[#allocation8] sm:$0x1] %v140_v41 }
 0x133   :  { %s324_s24 = scalar_lea.vmem %s414_s12, 16  ;;  %s328_s25 = scalar_lea.vmem %s414_s12, 32 }
 0x134   :  { %p325_p10 = scmp.ne.s32.totalorder %s414_s12, %s324_s24  ;;  %p329_p11 = scmp.lt.s32.totalorder %s414_s12, %s414_s12 }
 0x135   :  { %p330_p12 = scmp.lt.s32.totalorder %s328_s25, %s324_s24 }
 0x137   :  { %p331_p13 = por %p330_p12, %p329_p11 }
 0x139   :  { %p332_p0 = pnand %p331_p13, %p325_p10 }
 0x13b   :  { %335 = shalt.err (!%p332_p0)
}
 0x13c   :  { %s336_s28 = scalar_lea.hbm %s449_s3, 16 }
 0x13d   :  { %p337_p1 = scmp.ne.s32.totalorder %s449_s3, %s336_s28  ;;  %p340_p2 = scmp.lt.u32.totalorder %s336_s28, %s449_s3 }
 0x13f   :  { %p342_p3 = pnand %p340_p2, %p337_p1 }
 0x141   :  { %345 = shalt.err (!%p342_p3)
}
 0x142   :  { %162 = dma.vmem_to_hbm [thread:$0]  %s414_s12, 16, %s449_s3, [#allocation9]  }
 0x143   :  { %350 = dma.done.wait [#allocation4], 16  }
 0x144   :  { %351 = vsyncadd [#allocation4], 4294967280 }
 0x145   :  { %352 = dma.done.wait [#allocation9], 16  }
 0x146   :  { %353 = vsyncadd [#allocation9], 4294967280 }
 0x147   :  { %169 = vsyncpa [#allocation3], 1 }
 0x148   :  { %170 = vsyncpa [#allocation6], 1 }
 0x149   :  { %171 = vsyncpa [#allocation4], 1 }
 0x14a   :  { %172 = vsyncpa [#allocation9], 1 }

</bundles_post_ra>
